<compile_context>
chip_gen: v5e
topology: v5e:2x2
jax: 0.10.0
libtpu: 0.0.40
codegen_flags: <defaults>
</compile_context>

<pallas_src>
import functools

import jax
import jax.numpy as jnp
from jax.experimental import pallas as pl
from jax.experimental.pallas import tpu as pltpu


# --------------------------------------------------------------------------- #
# Kernels
# --------------------------------------------------------------------------- #
def _single_pass_kernel(x_ref, w_ref, o_ref, *, hw_valid, padded):
    """Whole (padded) H*W in one tile: conv + InstanceNorm + LeakyReLU at once."""
    # x_ref: (1, Cin, HWp)   w_ref: (Cout, Cin)   o_ref: (1, Cout, HWp)
    y = jnp.dot(w_ref[...], x_ref[0], preferred_element_type=jnp.float32)

    if padded:
        col = jax.lax.broadcasted_iota(jnp.int32, y.shape, 1)
        mask = col < hw_valid
        ym = jnp.where(mask, y, 0.0)
    else:
        ym = y

    inv_hw = jnp.float32(1.0 / hw_valid)
    mean = jnp.sum(ym, axis=-1, keepdims=True) * inv_hw
    # Two-pass (mean-centered) variance: everything is VMEM-resident, so the
    # extra VPU work is free relative to the HBM roofline and more accurate.
    if padded:
        d = jnp.where(mask, y - mean, 0.0)
    else:
        d = y - mean
    var = jnp.sum(d * d, axis=-1, keepdims=True) * inv_hw

    y_n = (y - mean) * jax.lax.rsqrt(var + jnp.float32(1e-5))
    out = jnp.where(y_n >= 0, y_n, jnp.float32(0.2) * y_n)
    o_ref[0] = out.astype(o_ref.dtype)


def _two_phase_kernel(x_ref, w_ref, o_ref, sum_ref, ssq_ref, ybuf_ref=None, *,
                      hw_valid, hw_tile, padded, y_resident):
    """Tiled H*W. Phase 0 accumulates per-(sample, channel) sum / sum-of-squares;
    phase 1 normalizes + LeakyReLU. If `y_resident`, the unnormalized conv
    output lives in VMEM scratch so x is read from HBM exactly once."""
    p = pl.program_id(1)
    t = pl.program_id(2)

    def conv():
        return jnp.dot(w_ref[...], x_ref[0], preferred_element_type=jnp.float32)

    def accumulate(y):
        if padded:
            col = t * hw_tile + jax.lax.broadcasted_iota(jnp.int32, y.shape, 1)
            ym = jnp.where(col < hw_valid, y, 0.0)
        else:
            ym = y
        sum_ref[...] += jnp.sum(ym, axis=-1, keepdims=True)
        ssq_ref[...] += jnp.sum(ym * ym, axis=-1, keepdims=True)

    def normalize_store(y):
        inv_hw = jnp.float32(1.0 / hw_valid)
        mean = sum_ref[...] * inv_hw
        var = jnp.maximum(ssq_ref[...] * inv_hw - mean * mean, 0.0)
        y_n = (y - mean) * jax.lax.rsqrt(var + jnp.float32(1e-5))
        out = jnp.where(y_n >= 0, y_n, jnp.float32(0.2) * y_n)
        o_ref[0] = out.astype(o_ref.dtype)

    @pl.when((p == 0) & (t == 0))
    def _init():
        sum_ref[...] = jnp.zeros_like(sum_ref)
        ssq_ref[...] = jnp.zeros_like(ssq_ref)

    if y_resident:
        @pl.when(p == 0)
        def _phase0():
            y = conv()
            accumulate(y)
            ybuf_ref[t] = y                      # keep unnormalized y in VMEM

        @pl.when(p == 1)
        def _phase1():
            normalize_store(ybuf_ref[t])         # no second x read / matmul
    else:
        y = conv()                               # needed by both phases

        @pl.when(p == 0)
        def _phase0():
            accumulate(y)

        @pl.when(p == 1)
        def _phase1():
            normalize_store(y)


# --------------------------------------------------------------------------- #
# Wrapper
# --------------------------------------------------------------------------- #
def _round_up(x, m):
    return ((x + m - 1) // m) * m


def _vmem_budget_bytes():
    """~75% of physical VMEM (headroom for compiler scratch / semaphores).

    v7x: 64 MiB -> ~48 MiB budget; v5e/v6e: 128 MiB -> ~96 MiB budget.
    Falls back to the smallest generation's budget if the query fails."""
    cap = None
    try:
        cap = int(pltpu.get_tpu_info().vmem_capacity_bytes)
    except Exception:
        cap = None
    if not cap or cap <= 0:
        cap = 64 * 1024 * 1024
    return (cap * 3) // 4


def output_block(x_nchw, weight, bias=None, *, hw_tile=None, allow_y_resident=True):
    """Fused 1x1 Conv2d + InstanceNorm2d(affine=False) + LeakyReLU(0.2).

    x_nchw: (B, Cin, H, W); weight: (Cout, Cin) or (Cout, Cin, 1, 1);
    bias: (Cout,) -- accepted for API parity with nn.Conv2d but mathematically
    cancelled by the (non-affine) InstanceNorm, so it is not used (this is also
    numerically better than adding it and subtracting its mean back out).
    Returns (B, Cout, H, W).
    """
    del bias  # cancels exactly under InstanceNorm2d(affine=False)

    B, Cin, H, W = x_nchw.shape
    Cout = weight.shape[0]
    weight = weight.reshape(Cout, Cin)
    HW = H * W
    itemsize = jnp.dtype(x_nchw.dtype).itemsize

    budget = _vmem_budget_bytes()

    # ---- spatial tile sizing: biggest lane-aligned tile the budget allows ----
    per_lane_stream = 2 * (Cin + Cout) * itemsize          # double-buffered x+out
    auto_max_tile = ((budget // 4) // per_lane_stream) // 128 * 128
    auto_max_tile = max(128, min(32768, auto_max_tile))
    hw_padded_min = _round_up(HW, 128)

    if hw_tile is None:
        hw_tile = min(hw_padded_min, auto_max_tile)
    else:
        if hw_tile <= 0 or hw_tile % 128 != 0:
            raise ValueError(f"hw_tile={hw_tile} must be a positive multiple of 128")

    HWp = _round_up(HW, hw_tile)                            # pad+mask, never a huge block
    num_t = HWp // hw_tile
    padded = HWp != HW

    # ---- input: free reshape, zero-pad the lane axis only if needed ----
    x = x_nchw.reshape(B, Cin, HW)
    if padded:
        x = jnp.pad(x, ((0, 0), (0, 0), (0, HWp - HW)))

    # ---- VMEM accounting: single-x-read (y resident) vs recompute fallback ----
    stream_bytes = 2 * (Cin + Cout) * hw_tile * itemsize
    ybuf_bytes = num_t * Cout * hw_tile * 4
    fixed_bytes = Cout * Cin * itemsize + 2 * Cout * 128 * 4 + (1 << 20)
    y_resident = (num_t > 1 and allow_y_resident
                  and ybuf_bytes + stream_bytes + fixed_bytes <= budget)

    need = stream_bytes + fixed_bytes + (ybuf_bytes if y_resident else 0)
    vmem_limit = int(min(budget, max(16 * 1024 * 1024, 2 * need)))

    # ---- advisory cost estimate (mem-bound custom call) ----
    x_reads = 1 if (num_t == 1 or y_resident) else 2
    cost = pl.CostEstimate(
        flops=2 * B * Cout * Cin * HWp + 8 * B * Cout * HWp,
        transcendentals=B * Cout,
        bytes_accessed=(x_reads * B * Cin * HWp + B * Cout * HWp + Cout * Cin) * itemsize,
    )

    out_shape = jax.ShapeDtypeStruct((B, Cout, HWp), x_nchw.dtype)

    if num_t == 1:
        # ---- single-pass fast path: one grid step per sample ----
        out = pl.pallas_call(
            functools.partial(_single_pass_kernel, hw_valid=HW, padded=padded),
            out_shape=out_shape,
            grid_spec=pltpu.PrefetchScalarGridSpec(
                num_scalar_prefetch=0,
                grid=(B,),
                in_specs=[
                    pl.BlockSpec((1, Cin, HWp), lambda b: (b, 0, 0)),
                    pl.BlockSpec((Cout, Cin), lambda b: (0, 0)),
                ],
                out_specs=pl.BlockSpec((1, Cout, HWp), lambda b: (b, 0, 0)),
            ),
            compiler_params=pltpu.CompilerParams(
                dimension_semantics=("parallel",),
                vmem_limit_bytes=vmem_limit,
            ),
            cost_estimate=cost,
        )(x, weight)
    else:
        # ---- tiled two-phase path ----
        scratch = [
            pltpu.VMEM((Cout, 1), jnp.float32),   # per-channel sum
            pltpu.VMEM((Cout, 1), jnp.float32),   # per-channel sum of squares
        ]
        if y_resident:
            scratch.append(pltpu.VMEM((num_t, Cout, hw_tile), jnp.float32))
            # During phase 1 park x's window (no streaming; y comes from VMEM).
            x_map = lambda b, p, t: (b, 0, t * (1 - p))
        else:
            x_map = lambda b, p, t: (b, 0, t)

        out = pl.pallas_call(
            functools.partial(_two_phase_kernel, hw_valid=HW, hw_tile=hw_tile,
                              padded=padded, y_resident=y_resident),
            out_shape=out_shape,
            grid_spec=pltpu.PrefetchScalarGridSpec(
                num_scalar_prefetch=0,
                # (batch, phase: 0 = stats / 1 = normalize, hw tile)
                grid=(B, 2, num_t),
                in_specs=[
                    pl.BlockSpec((1, Cin, hw_tile), x_map),
                    pl.BlockSpec((Cout, Cin), lambda b, p, t: (0, 0)),
                ],
                # During phase 0 nothing is written; park the output window on
                # tile 0 (t*p == 0) so writeback only happens during phase 1.
                out_specs=pl.BlockSpec((1, Cout, hw_tile),
                                       lambda b, p, t: (b, 0, t * p)),
                scratch_shapes=scratch,
            ),
            compiler_params=pltpu.CompilerParams(
                # Batch shards across TensorCores; phase/tile axes carry the
                # cross-tile statistics and must stay sequential.
                dimension_semantics=("parallel", "arbitrary", "arbitrary"),
                vmem_limit_bytes=vmem_limit,
            ),
            cost_estimate=cost,
        )(x, weight)

    if padded:
        out = out[:, :, :HW]
    return out.reshape(B, Cout, H, W)


# --------------------------------------------------------------------------- #
# Pure-JAX reference (matches the PyTorch OutputBlock forward, eval semantics)
# --------------------------------------------------------------------------- #
def _reference(x_nchw, weight, bias):
    weight = weight.reshape(weight.shape[0], -1)
    y = jnp.einsum("bchw,oc->bohw", x_nchw, weight) + bias[None, :, None, None]
    mean = jnp.mean(y, axis=(2, 3), keepdims=True)
    var = jnp.mean((y - mean) ** 2, axis=(2, 3), keepdims=True)
    yn = (y - mean) * jax.lax.rsqrt(var + 1e-5)
    return jnp.where(yn >= 0, yn, 0.2 * yn)


if __name__ == "__main__":
    key = jax.random.PRNGKey(0)
    kx, kw, kb, kx2 = jax.random.split(key, 4)

    B, Cin, Cout = 2, 4, 8
    # Shapes match nn.Conv2d(Cin, Cout, 1): weight (Cout, Cin, 1, 1) squeezed.
    weight = jax.random.normal(kw, (Cout, Cin), dtype=jnp.float32) * 0.1
    bias = jax.random.normal(kb, (Cout,), dtype=jnp.float32) * 0.1

    x16 = jax.random.normal(kx, (B, Cin, 16, 16), dtype=jnp.float32)   # HW = 256
    x15 = jax.random.normal(kx2, (B, Cin, 15, 15), dtype=jnp.float32)  # HW = 225

    def check(x, **kwargs):
        y = jax.block_until_ready(output_block(x, weight, bias, **kwargs))
        y_ref = _reference(x, weight, bias)
        assert y.shape == y_ref.shape, (y.shape, y_ref.shape)
        err = float(jnp.max(jnp.abs(y - y_ref)))
        assert jnp.allclose(y, y_ref, atol=1e-4, rtol=1e-4), err

    # 1) single-pass fast path (default: HW fits in one tile)
    check(x16)
    # 2) two-phase path with y resident in VMEM (single x read)
    check(x16, hw_tile=128)
    # 3) two-phase recompute fallback (large-activation case)
    check(x16, hw_tile=128, allow_y_resident=False)
    # 4) single-pass path with non-128-aligned HW (pad + lane mask)
    check(x15)
    # 5) two-phase path with non-128-aligned HW (pad + lane mask)
    check(x15, hw_tile=128)

    print("KERNEL_OK")
</pallas_src>

<mosaic_0001>
module attributes {stable_mosaic.version = 11 : i64} {
  func.func @_single_pass_kernel(%arg0: i32, %arg1: memref<1x4x256xf32, #tpu.memory_space<vmem>>, %arg2: memref<8x4xf32, #tpu.memory_space<vmem>>, %arg3: memref<1x8x256xf32, #tpu.memory_space<vmem>>) attributes {dimension_semantics = [#tpu.dimension_semantics<parallel>], iteration_bounds = array<i64: 2>, scalar_prefetch = 0 : i64, scratch_operands = 0 : i64, tpu.core_type = #tpu.core_type<tc>, window_params = [{transform_indices = @transform_0, window_bounds = array<i64: 1, 4, 256>}, {pipeline_mode = #tpu.pipeline_mode<synchronous>, transform_indices = @transform_1, window_bounds = array<i64: 8, 4>}, {transform_indices = @transform_2, window_bounds = array<i64: 1, 8, 256>}]} {
    %c0 = arith.constant 0 : index
    %c0_0 = arith.constant 0 : index
    %0 = vector.load %arg2[%c0, %c0_0] : memref<8x4xf32, #tpu.memory_space<vmem>>, vector<8x4xf32>
    %c0_1 = arith.constant 0 : index
    %c0_2 = arith.constant 0 : index
    %c0_3 = arith.constant 0 : index
    %1 = vector.load %arg1[%c0_1, %c0_2, %c0_3] : memref<1x4x256xf32, #tpu.memory_space<vmem>>, vector<1x4x256xf32>
    %2 = vector.shape_cast %1 : vector<1x4x256xf32> to vector<4x256xf32>
    %cst = arith.constant dense<0.000000e+00> : vector<8x256xf32>
    %3 = tpu.matmul %0, %2, %cst {dimension_numbers = #tpu.dot_dimension_numbers<[1], [0], [0], [1], [0, 0, 1, 1], [], []>} : vector<8x4xf32>, vector<4x256xf32>, vector<8x256xf32> -> vector<8x256xf32>
    %cst_4 = arith.constant dense<0.000000e+00> : vector<8xf32>
    %4 = vector.multi_reduction <add>, %3, %cst_4 [1] : vector<8x256xf32> to vector<8xf32>
    %5 = vector.shape_cast %4 : vector<8xf32> to vector<8x1xf32>
    %cst_5 = arith.constant 3.906250e-03 : f32
    %6 = vector.broadcast %cst_5 : f32 to vector<8x1xf32>
    %7 = arith.mulf %5, %6 : vector<8x1xf32>
    %8 = vector.broadcast %7 : vector<8x1xf32> to vector<8x256xf32>
    %9 = arith.subf %3, %8 : vector<8x256xf32>
    %10 = arith.mulf %9, %9 : vector<8x256xf32>
    %cst_6 = arith.constant dense<0.000000e+00> : vector<8xf32>
    %11 = vector.multi_reduction <add>, %10, %cst_6 [1] : vector<8x256xf32> to vector<8xf32>
    %12 = vector.shape_cast %11 : vector<8xf32> to vector<8x1xf32>
    %cst_7 = arith.constant 3.906250e-03 : f32
    %13 = vector.broadcast %cst_7 : f32 to vector<8x1xf32>
    %14 = arith.mulf %12, %13 : vector<8x1xf32>
    %15 = vector.broadcast %7 : vector<8x1xf32> to vector<8x256xf32>
    %16 = arith.subf %3, %15 : vector<8x256xf32>
    %cst_8 = arith.constant 9.99999974E-6 : f32
    %17 = vector.broadcast %cst_8 : f32 to vector<8x1xf32>
    %18 = arith.addf %14, %17 : vector<8x1xf32>
    %19 = math.rsqrt %18 : vector<8x1xf32>
    %20 = vector.broadcast %19 : vector<8x1xf32> to vector<8x256xf32>
    %21 = arith.mulf %16, %20 : vector<8x256xf32>
    %cst_9 = arith.constant 0.000000e+00 : f32
    %22 = vector.broadcast %cst_9 : f32 to vector<8x256xf32>
    %23 = arith.cmpf oge, %21, %22 : vector<8x256xf32>
    %cst_10 = arith.constant 2.000000e-01 : f32
    %24 = vector.broadcast %cst_10 : f32 to vector<8x256xf32>
    %25 = arith.mulf %24, %21 : vector<8x256xf32>
    %26 = arith.select %23, %21, %25 : vector<8x256xi1>, vector<8x256xf32>
    %c0_11 = arith.constant 0 : index
    %c0_12 = arith.constant 0 : index
    %c0_13 = arith.constant 0 : index
    %27 = vector.load %arg3[%c0_11, %c0_12, %c0_13] : memref<1x8x256xf32, #tpu.memory_space<vmem>>, vector<1x8x256xf32>
    %28 = vector.shape_cast %27 : vector<1x8x256xf32> to vector<8x256xf32>
    %29 = vector.shape_cast %26 : vector<8x256xf32> to vector<1x8x256xf32>
    tpu.vector_store %arg3[%c0_11, %c0_12, %c0_13], %29 {strides = array<i32>} : memref<1x8x256xf32, #tpu.memory_space<vmem>>, vector<1x8x256xf32>,
    return
  }
  func.func @transform_0(%arg0: i32) -> (i32, i32, i32) {
    %c0_i32 = arith.constant 0 : i32
    %c0_i32_0 = arith.constant 0 : i32
    %c0_i32_1 = arith.constant 0 : i32
    return %arg0, %c0_i32, %c0_i32_0 : i32, i32, i32
  }
  func.func @transform_1(%arg0: i32) -> (i32, i32) {
    %c0_i32 = arith.constant 0 : i32
    %c0_i32_0 = arith.constant 0 : i32
    %c0_i32_1 = arith.constant 0 : i32
    return %c0_i32, %c0_i32_0 : i32, i32
  }
  func.func @transform_2(%arg0: i32) -> (i32, i32, i32) {
    %c0_i32 = arith.constant 0 : i32
    %c0_i32_0 = arith.constant 0 : i32
    %c0_i32_1 = arith.constant 0 : i32
    return %arg0, %c0_i32, %c0_i32_0 : i32, i32, i32
  }
}

</mosaic_0001>

<bundles_post_ra>
// kernel: tpu_custom_call.1
= control target key start
LH: loop header
LB: loop body
LE: loop exit
PB: predicated region body
PF: predicated region fallthrough
CT: control target
= control target key end

     0   :  { %7 = vsyncpa [#allocation3], 0  ;;  %s649_s0 = inlined_call_operand.hbm [shape: f32[2,4,256], index: 0, kind: input, shape index: {}]   ;;  %s650_s1 = inlined_call_operand.vmem [shape: f32[8,4], index: 1, kind: input, shape index: {}]   ;;  %s651_s2 = inlined_call_operand.hbm [shape: f32[2,8,256], index: 2, kind: output, shape index: {}]  }
   0x1   :  { %9 = vsyncpa [#allocation3 + $0x1], 0 }
   0x2   :  { %10 = vsyncpa [#allocation4], 0 }
   0x3   :  { %12 = vsyncpa [#allocation4 + $0x1], 0  ;;  %s518_s9 = smov 0   ;;  %s520_s10 = smov 0  }
   0x4   :  { %s522_s11 = smov 0   ;;  %s524_s12 = smov 0  }
   0x5 LB: > { %s539_s13 = sadd.s32 4294967295, %s501_s12   ;;  %s337_s14 = sadd.s32 4294967294, %s501_s12   ;;  %s501_s12 = sphi %s524_s12, %s661_s12   ;;  %s497_s11 = sphi %s522_s11, %s660_s11   ;;  %s493_s10 = sphi %s520_s10, %s659_s10   ;;  %s489_s9 = sphi %s518_s9, %s658_s9  }
   0x6   : > { %s543_s15 = sadd.s32 1, %s501_s12   ;;  %s25_s16 = sadd.s32 1, %s497_s11 }
   0x7   : > { %s22_s17 = ssub.s32 %s501_s12, %s543_s15  ;;  %p32_p0 = scmp.ne.s32.totalorder %s497_s11, %s493_s10 }
   0x8   : > { %p23_p1 = scmp.eq.s32.totalorder %s22_s17, 0  ;;  %p33_p2 = scmp.eq.s32.totalorder %s501_s12, 0 }
   0x9   : > { %p38_p3 = scmp.ne.s32.totalorder %s493_s10, %s489_s9  ;;  %p39_p4 = scmp.eq.s32.totalorder %s539_s13, 0 }
   0xa   : > { %s555_s18 = scalar_select %p23_p1, %s497_s11, %s25_s16  }
   0xb   : > { %p557_p5 = por %p33_p2, %p32_p0  ;;  %p561_p6 = por %p39_p4, %p38_p3 }
   0xc   : > { %p83_p7 = scmp.eq.s32.totalorder %s539_s13, 1  ;;  %p89_p8 = scmp.eq.s32.totalorder %s337_s14, 1 }
   0xd   : > { %p369_p10 = scmp.lt.s32.totalorder %s501_s12, 2  ;;  %s112_s23 = sand.u32 1, %s497_s11  }
   0xe   : > { %p568_p11 = por %p83_p7, %p32_p0  ;;  %p572_p12 = por %p89_p8, %p38_p3 }
   0xf   : > { %s355_s24 = sshll.u32 %s501_s12, 3  ;;  %s340_s25 = sshll.u32 %s112_s23, 3 }
  0x10   : > { %s121_s28 = scalar_lea.hbm %s649_s0, %s355_s24  ;;  %s116_s30 = scalar_lea.vmem [#allocation2], %s340_s25 }
  0x11   : > { %s123_s29 = sshll.u32 %s121_s28, 4  ;;  %s125_s3 = sshll.u32 %s116_s30, 4  ;;  %s124_s29 = int_to_ptr.hbm [resolvable:$true] %s123_s29  ;;  %s126_s3 = int_to_ptr.vmem [resolvable:$true] %s125_s3 }
  0x12   : > { %p583_p13 = pnand %p369_p10, %p557_p5  ;;  %p343_p0 = scmp.ge.s32.totalorder %s501_s12, 1 }
  0x13   : > { %p130_p1 = scmp.lt.s32.totalorder %s501_s12, 3  ;;  %s113_s5 = scalar_lea.sflag [#allocation3], %s112_s23 }
  0x14   : > { %s405_s6 = sshra.s32 %s124_s29, 4  ;;  %p409_p3 = pneg %p583_p13  ;;  %s406_s6 = int_to_ptr.hbm [resolvable:$true] %s405_s6 }
  0x15   : > { %s407_s7 = scalar_lea.hbm %s406_s6, 8  ;;  %s412_s16 = scalar_lea.hbm %s649_s0, 16 }
  0x16   : > { %p408_p2 = scmp.ne.s32.totalorder %s406_s6, %s407_s7  ;;  %p413_p5 = scmp.lt.s32.totalorder %s406_s6, %s649_s0 }
  0x17   : > { %p414_p8 = scmp.lt.s32.totalorder %s412_s16, %s407_s7 }
  0x18   : > { %p410_p4 = pnand %p409_p3, %p408_p2 }
  0x19   : > { %p415_p10 = por %p414_p8, %p413_p5 }
  0x1a   : > { %p411_p7 = pneg %p410_p4 }
  0x1c   : > { %p416_p9 = pnand %p415_p10, %p411_p7 }
  0x1e   : > { %419 = shalt.err (!%p416_p9)
}
  0x1f   : > { %364 = dma.hbm_to_vmem [thread:$0]  (!%p583_p13), %s124_s29, 128, %s126_s3, %s113_s5  }
  0x20   : > { %p131_p2 = pnand %p343_p0, %p130_p1 }
  0x21   : > { %s604_s23 = sand.u32 (!%p131_p2), 1, %s493_s10  }
  0x22   : > { %134 = sbr.rel (%p131_p2) target bundleno = 449 (0x1c1), region = 28  ;;  %s344_s24 = sshll.u32 (!%p131_p2), %s604_s23, 3 }
  0x23   : > { %s137_s25 = scalar_lea.sflag (!%p131_p2), [#allocation3], %s604_s23  ;;  %s140_s26 = scalar_lea.vmem (!%p131_p2), [#allocation2], %s344_s24 }
  0x27   : > { %480 = dma.done.wait (%p561_p6), %s137_s25, 128  }
  0x28   : > { %482 = vsyncadd (%p561_p6), %s137_s25, 4294967168  ;;  %v163_v0 = vld [vmem:[%s140_s26] sm:$0xff]  ;;  %vm172_vm0 = vcmask 1043456   ;;  %v162_v1 = vld [vmem:[%s650_s1] sm:$0xff]  ;;  %vm168_vm1 = vcmask 31744   ;;  %s345_s20 = sshll.u32 %s604_s23, 4 }
  0x29   : > { %165 = vst [vmem:[#allocation1] ss:$2 sm:$0xff] %v163_v0  ;;  %s356_s29 = sshll.u32 %s539_s13, 4  ;;  %s161_s5 = scalar_lea.vmem [#allocation5], %s345_s20 }
  0x2a   : > { %s262_s4 = scalar_lea.hbm %s651_s2, %s356_s29  ;;  %s264_s6 = sshll.u32 %s161_s5, 4  ;;  %s265_s6 = int_to_ptr.vmem [resolvable:$true] %s264_s6 }
  0x2b   : > { %s266_s7 = sshll.u32 %s262_s4, 4  ;;  %s251_s13 = scalar_lea.sflag [#allocation4], %s604_s23  ;;  %s267_s7 = int_to_ptr.hbm [resolvable:$true] %s266_s7 }
  0x2c   : > { %s449_s8 = sshra.s32 %s267_s7, 4  ;;  %s455_s19 = scalar_lea.hbm %s651_s2, 32  ;;  %s450_s8 = int_to_ptr.hbm [resolvable:$true] %s449_s8 }
  0x2d   : > { %s451_s14 = scalar_lea.hbm %s450_s8, 16  ;;  %p456_p0 = scmp.lt.s32.totalorder %s450_s8, %s651_s2 }
  0x2e   : > { %p452_p6 = scmp.ne.s32.totalorder %s450_s8, %s451_s14  ;;  %p457_p1 = scmp.lt.s32.totalorder %s455_s19, %s451_s14 }
  0x30   : > { %v166_v2 = vld.sshfl [vmem:[#allocation1] sm:$0xff pattern:$0x75316420]  ;;  %v167_v3 = vld.sshfl [vmem:[#allocation1 + $0x8] sm:$0xff pattern:$0x75316420]  ;;  %p453_p9 = pnand %p452_p6, %p568_p11  ;;  %p458_p3 = por %p457_p1, %p456_p0 }
  0x31   : > { %346 = vmatpush.msk.msra.mxu0 %vm172_vm0, %v166_v2  ;;  %348 = vmatpush.msk.msra.mxu1 %vm172_vm0, %v167_v3 }
  0x32   : > { %347 = vmatmul.msk.f32.vlgmr.msra.gmra.mxu0 %vm168_vm1, %v162_v1  ;;  %349 = vmatmul.msk.f32.vlgmr.msra.gmra.mxu1 %vm168_vm1, %v162_v1  ;;  %p454_p13 = pneg %p453_p9 }
  0x34   : > { %p459_p4 = pnand %p458_p3, %p454_p13 }
  0xaf   : > { %v194_v4 = vpop.f32.mrf.mxu0  ;;  %v214_v5 = vpop.f32.mrf.mxu1 }
  0xb0   : > { %v217_v6 = vadd.f32 %v214_v5, %v194_v4 }
  0xb2   : > { %218 = vadd.xlane.f32.xlu0 %v217_v6 }
 0x125   : > { %v219_v7 = vpop.xlane.xlu0 %218 }
 0x126   : > { %v220_v8 = vmul.f32 0.00390625, %v219_v7 }
 0x128   : > { %v221_v9 = vsub.f32 %v194_v4, %v220_v8  ;;  %v222_v10 = vsub.f32 %v214_v5, %v220_v8 }
 0x12a   : > { %v223_v11 = vmul.f32 %v221_v9, %v221_v9  ;;  %v224_v12 = vmul.f32 %v222_v10, %v222_v10 }
 0x12c   : > { %v225_v13 = vadd.f32 %v224_v12, %v223_v11 }
 0x12e   : > { %226 = vadd.xlane.f32.xlu0 %v225_v13 }
 0x1a1   : > { %v227_v14 = vpop.xlane.xlu0 %226 }
 0x1a2   : > { %v228_v15 = vmul.f32 0.00390625, %v227_v14 }
 0x1a4   : > { %v229_v16 = vadd.f32 1e-05, %v228_v15 }
 0x1a6   : > { %403 = vrsqrt.f32 %v229_v16  ;;  %vm236_vm3 = vweird.f32 %v229_v16 }
 0x1ac   : > { %v404_v17 = vpop.eup %403 }
 0x1ad   : > { %v231_v18 = vmul.f32 %v404_v17, %v229_v16  ;;  %vm237_vm2 = vweird.f32 %v404_v17 }
 0x1ae   : > { %vm238_vm4 = vmor %vm236_vm3, %vm237_vm2 }
 0x1af   : > { %v232_v19 = vmul.f32 %v404_v17, %v231_v18 }
 0x1b1   : > { %v233_v20 = vmul.f32 0.5, %v232_v19 }
 0x1b3   : > { %v234_v21 = vsub.f32 1.5, %v233_v20 }
 0x1b5   : > { %v235_v22 = vmul.f32 %v404_v17, %v234_v21 }
 0x1b7   : > { %v239_v23 = vsel %vm238_vm4, %v404_v17, %v235_v22 }
 0x1b8   : > { %v240_v24 = vmul.f32 %v239_v23, %v221_v9  ;;  %v241_v25 = vmul.f32 %v239_v23, %v222_v10 }
 0x1ba   : > { %v244_v26 = vmul.f32 0.2, %v240_v24  ;;  %v245_v27 = vmul.f32 0.2, %v241_v25  ;;  %vm242_vm5 = vcmp.ge.f32.partialorder %v240_v24, 0.0  ;;  %vm243_vm6 = vcmp.ge.f32.partialorder %v241_v25, 0.0 }
 0x1bc   : > { %v246_v28 = vsel %vm242_vm5, %v240_v24, %v244_v26  ;;  %v247_v29 = vsel %vm243_vm6, %v241_v25, %v245_v27 }
 0x1bd   : > { %248 = vst [vmem:[%s161_s5] sm:$0xff] %v246_v28 }
 0x1be   : > { %249 = vst [vmem:[%s161_s5 + $0x8] sm:$0xff] %v247_v29 }
 0x1bf   : > { %462 = shalt.err (!%p459_p4)
}
 0x1c0   : > { %359 = dma.vmem_to_hbm [thread:$0]  (%p568_p11), %s265_s6, 256, %s267_s7, %s251_s13  }
 0x1c1 PF: > { %s278_s23 = sand.u32 1, %s489_s9   ;;  %p657_p7 = scmp.ge.s32.totalorder %s501_s12, 2 }
 0x1c2   : > { %s279_s26 = scalar_lea.sflag [#allocation4], %s278_s23 }
 0x1c3   : > { %p366_p5 = pnand %p657_p7, %p572_p12 }
 0x1c5   : > { %p367_p8 = pneg %p366_p5 }
 0x1c7   : > { %484 = dma.done.wait (%p367_p8), %s279_s26, 256  }
 0x1c8   : > { %486 = vsyncadd (%p367_p8), %s279_s26, 4294967040  ;;  %p15_p10 = scmp.ge.s32.totalorder %s543_s15, 4   ;;  %s658_s9 = smov %s493_s10 }
 0x1c9   : > { %s659_s10 = smov %s497_s11  ;;  %s660_s11 = smov %s555_s18 }
 0x1ca   : > { %s661_s12 = smov %s543_s15  ;;  %17 = sbr.rel (!%p15_p10) target bundleno = 5 (0x5), region = 73 }
 0x1cf   :  { %285 = vsyncpa [#allocation3], 1 }
 0x1d0   :  { %287 = vsyncpa [#allocation3 + $0x1], 1 }
 0x1d1   :  { %288 = vsyncpa [#allocation4], 1 }
 0x1d2   :  { %290 = vsyncpa [#allocation4 + $0x1], 1 }

</bundles_post_ra>
